<compile_context>
chip_gen: v6e
topology: v6e:2x2x1
jax: 0.10.0
libtpu: 0.0.40
codegen_flags: <defaults>
</compile_context>

<pallas_src>
import functools

import jax
import jax.numpy as jnp
from jax.experimental import pallas as pl
from jax.experimental.pallas import tpu as pltpu

_LANE = 128  # lane width of a vreg; last-dim tile multiple


def _cdiv(a, b):
    return -(-a // b)


def _round_up(x, m):
    return _cdiv(x, m) * m


def _sublane_multiple(dtype):
    # f32 -> 8, bf16 -> 16, int8 -> 32 (sub-32-bit dtypes pack along sublanes).
    return max(8, 32 // jnp.dtype(dtype).itemsize)


@functools.lru_cache(maxsize=None)
def _buffered_supported():
    """One-time probe: does this build accept pipeline_mode=pl.Buffered(1)?"""
    if not hasattr(pl, "Buffered"):
        return False
    try:
        def _copy(x_ref, o_ref):
            o_ref[...] = x_ref[...]

        fn = pl.pallas_call(
            _copy,
            out_shape=jax.ShapeDtypeStruct((8, _LANE), jnp.float32),
            grid=(1,),
            in_specs=[pl.BlockSpec((8, _LANE), lambda i: (0, 0),
                                   pipeline_mode=pl.Buffered(1))],
            out_specs=pl.BlockSpec((8, _LANE), lambda i: (0, 0)),
        )
        jax.block_until_ready(fn(jnp.zeros((8, _LANE), jnp.float32)))
        return True
    except Exception:  # noqa: BLE001 - probe only; fall back to double-buffering
        return False


@functools.lru_cache(maxsize=None)
def _vmem_capacity_bytes():
    try:
        cap = int(getattr(pltpu.get_tpu_info(), "vmem_capacity_bytes"))
        if cap > 0:
            return cap
    except Exception:  # noqa: BLE001
        pass
    return 64 * 1024 * 1024  # conservative fallback (v7x per-TC VMEM)


def _vmem_limit_bytes(block_b, in_dim, h_p, tn, itemsize, w1_bufs, w2_bufs):
    acts = 2 * block_b * in_dim + 2 * block_b * tn             # x / out double-buffered
    wts = w1_bufs * (in_dim * h_p + h_p) + w2_bufs * (h_p * tn + tn)
    interm = 4 * block_b * (h_p + tn)                           # f32 hidden + accumulator
    need = (acts + wts) * itemsize + interm
    ceiling = int(_vmem_capacity_bytes() * 0.85)                # headroom for Mosaic scratch
    # TODO(synk): if `need` exceeds `ceiling` (very large In*H), add an
    # "arbitrary" H-reduction grid axis with a VMEM accumulator instead of clamping.
    return int(min(max(int(need * 1.5), 32 * 1024 * 1024), ceiling))


def _embedding_kernel(x_ref, w1_ref, b1_ref, w2_ref, b2_ref, o_ref, *, use_bf16_mxu):
    """Fused MLP on one (batch tile, out tile): relu(x @ w1 + b1) @ w2 + b2."""
    x = x_ref[...]                                   # (tb, In)
    w1 = w1_ref[...]                                 # (In, H_p)
    if use_bf16_mxu and w1.dtype == jnp.float32:
        x = x.astype(jnp.bfloat16)
        w1 = w1.astype(jnp.bfloat16)
    h = jnp.dot(x, w1, preferred_element_type=jnp.float32)
    h = h + b1_ref[...].astype(jnp.float32)
    h = jnp.maximum(h, 0.0)                          # ReLU in f32 (VPU)

    w2 = w2_ref[...]                                 # (H_p, tn)
    if use_bf16_mxu and w2.dtype == jnp.float32:
        w2 = w2.astype(jnp.bfloat16)
    out = jnp.dot(h.astype(w2.dtype), w2, preferred_element_type=jnp.float32)
    out = out + b2_ref[...].astype(jnp.float32)
    o_ref[...] = out.astype(o_ref.dtype)             # lane-dense (tn % 128 == 0)


def _forward_padded(x, w1_p, b1_p, w2_p, b2_p, *, out_size,
                    block_b_target=512, tn_target=512, use_bf16_mxu=False):
    B, in_dim = x.shape
    in_w, h_p = w1_p.shape
    h_w, out_p = w2_p.shape
    assert in_w == in_dim and h_w == h_p, "padded weight shapes inconsistent"
    assert h_p % _LANE == 0 and out_p % _LANE == 0
    dtype = x.dtype
    sub = _sublane_multiple(dtype)

    # ---- output tile: multiple of 128 that divides out_p -------------------
    tn = out_p
    if out_p > tn_target:
        tn = _LANE
        for cand in range(min(out_p, tn_target), _LANE - 1, -_LANE):
            if out_p % cand == 0:
                tn = cand
                break
    n_o = out_p // tn

    # ---- waste-aware batch tile --------------------------------------------
    tgt = max(sub, min(block_b_target, _round_up(B, sub)))
    n_b = _cdiv(B, tgt)
    block_b = _round_up(_cdiv(B, n_b), sub)
    # v7x megacore: ensure >= 2 grid steps when the batch allows it.
    if n_b * n_o == 1 and B >= 2 * sub:
        block_b = _round_up(_cdiv(B, 2), sub)
    b_p = _round_up(B, block_b)
    n_b = b_p // block_b

    # Pad the batch only; x feature dim stays unpadded (block covers full dim).
    x_p = x if b_p == B else jnp.zeros((b_p, in_dim), dtype).at[:B, :].set(x)

    buffered = _buffered_supported()
    resident = {"pipeline_mode": pl.Buffered(1)} if buffered else {}
    # w1/b1 have a constant index_map -> single-buffer to halve their residency.
    w1_spec = pl.BlockSpec((in_dim, h_p), lambda j, i: (0, 0), **resident)
    b1_spec = pl.BlockSpec((1, h_p), lambda j, i: (0, 0), **resident)
    # w2/b2 are constant only when the output is untiled.
    res2 = resident if n_o == 1 else {}
    w2_spec = pl.BlockSpec((h_p, tn), lambda j, i: (0, j), **res2)
    b2_spec = pl.BlockSpec((1, tn), lambda j, i: (0, j), **res2)

    w1_bufs = 1 if buffered else 2
    w2_bufs = 1 if (buffered and n_o == 1) else 2

    kernel = functools.partial(_embedding_kernel, use_bf16_mxu=use_bf16_mxu)
    fn = pl.pallas_call(
        kernel,
        out_shape=jax.ShapeDtypeStruct((b_p, out_p), dtype),
        grid_spec=pltpu.PrefetchScalarGridSpec(
            num_scalar_prefetch=0,
            grid=(n_o, n_b),                       # out tiles slow, batch fast:
            in_specs=[                             # weights fetched once per out tile
                pl.BlockSpec((block_b, in_dim), lambda j, i: (i, 0)),   # x tile
                w1_spec, b1_spec, w2_spec, b2_spec,
            ],
            out_specs=pl.BlockSpec((block_b, tn), lambda j, i: (i, j)),
        ),
        compiler_params=pltpu.CompilerParams(
            dimension_semantics=("parallel", "parallel"),
            vmem_limit_bytes=_vmem_limit_bytes(
                block_b, in_dim, h_p, tn, jnp.dtype(dtype).itemsize,
                w1_bufs, w2_bufs),
        ),
    )
    out = fn(x_p, w1_p, b1_p, w2_p, b2_p)
    return out[:B, :out_size]


_apply_padded = jax.jit(
    _forward_padded,
    static_argnames=("out_size", "block_b_target", "tn_target", "use_bf16_mxu"))


def _pad_params(w1, b1, w2, b2):
    in_dim, hidden = w1.shape
    hidden2, out = w2.shape
    assert hidden2 == hidden, "weight shapes inconsistent"
    h_p = _round_up(hidden, _LANE)
    out_p = _round_up(out, _LANE)
    b1_2d = b1.reshape(1, hidden)
    b2_2d = b2.reshape(1, out)
    w1_p = w1 if h_p == hidden else \
        jnp.zeros((in_dim, h_p), w1.dtype).at[:, :hidden].set(w1)
    b1_p = b1_2d if h_p == hidden else \
        jnp.zeros((1, h_p), b1.dtype).at[:, :hidden].set(b1_2d)
    w2_p = w2 if (h_p == hidden and out_p == out) else \
        jnp.zeros((h_p, out_p), w2.dtype).at[:hidden, :out].set(w2)
    b2_p = b2_2d if out_p == out else \
        jnp.zeros((1, out_p), b2.dtype).at[:, :out].set(b2_2d)
    return w1_p, b1_p, w2_p, b2_p, out


def make_embedding_network(w1, b1, w2, b2, *, block_b_target=512, tn_target=512,
                           use_bf16_mxu=False):
    """Pad / cache the weights once; return a jitted apply(x)."""
    w1_p, b1_p, w2_p, b2_p, out = _pad_params(w1, b1, w2, b2)

    def apply(x):
        return _apply_padded(x, w1_p, b1_p, w2_p, b2_p, out_size=out,
                             block_b_target=block_b_target, tn_target=tn_target,
                             use_bf16_mxu=use_bf16_mxu)

    return apply


@functools.partial(jax.jit,
                   static_argnames=("block_b_target", "tn_target", "use_bf16_mxu"))
def embedding_network(x, w1, b1, w2, b2, *, block_b_target=512, tn_target=512,
                      use_bf16_mxu=False):
    """One-shot convenience entry point (pads weights under the same jit)."""
    w1_p, b1_p, w2_p, b2_p, out = _pad_params(w1, b1, w2, b2)
    return _forward_padded(x, w1_p, b1_p, w2_p, b2_p, out_size=out,
                           block_b_target=block_b_target, tn_target=tn_target,
                           use_bf16_mxu=use_bf16_mxu)


def init_params(key, input_size, hidden_size, output_size, dtype=jnp.float32):
    """Deterministic init mimicking nn.Linear (uniform +/- 1/sqrt(fan_in))."""
    k1, k2, k3, k4 = jax.random.split(key, 4)
    lim1 = 1.0 / jnp.sqrt(input_size)
    lim2 = 1.0 / jnp.sqrt(hidden_size)
    w1 = jax.random.uniform(k1, (input_size, hidden_size), dtype, -lim1, lim1)
    b1 = jax.random.uniform(k2, (1, hidden_size), dtype, -lim1, lim1)
    w2 = jax.random.uniform(k3, (hidden_size, output_size), dtype, -lim2, lim2)
    b2 = jax.random.uniform(k4, (1, output_size), dtype, -lim2, lim2)
    return w1, b1, w2, b2


if __name__ == "__main__":
    key = jax.random.PRNGKey(0)
    kx, kp = jax.random.split(key)

    batch = 16
    input_size, hidden_size, output_size = 32, 64, 16

    x = jax.random.normal(kx, (batch, input_size), jnp.float32)
    w1, b1, w2, b2 = init_params(kp, input_size, hidden_size, output_size)

    # Preferred path: weights padded/cached once, jitted apply.
    net = make_embedding_network(w1, b1, w2, b2)
    out = jax.block_until_ready(net(x))

    # Also exercise the one-shot convenience path.
    out2 = jax.block_until_ready(embedding_network(x, w1, b1, w2, b2))

    # Pure-JAX reference check (f32 end-to-end; MXU accumulation may differ
    # slightly from XLA, hence the small tolerance).
    ref = jnp.maximum(x @ w1 + b1, 0.0) @ w2 + b2
    assert out.shape == (batch, output_size)
    assert jnp.allclose(out, ref, atol=1e-4, rtol=1e-4), "mismatch vs reference"
    assert jnp.allclose(out2, ref, atol=1e-4, rtol=1e-4), "mismatch vs reference"

    print("KERNEL_OK")
</pallas_src>

<mosaic_0001>
module attributes {stable_mosaic.version = 11 : i64} {
  func.func @_embedding_kernel(%arg0: i32, %arg1: i32, %arg2: memref<8x32xf32, #tpu.memory_space<vmem>>, %arg3: memref<32x128xf32, #tpu.memory_space<vmem>>, %arg4: memref<1x128xf32, #tpu.memory_space<vmem>>, %arg5: memref<128x128xf32, #tpu.memory_space<vmem>>, %arg6: memref<1x128xf32, #tpu.memory_space<vmem>>, %arg7: memref<8x128xf32, #tpu.memory_space<vmem>>) attributes {dimension_semantics = [#tpu.dimension_semantics<parallel>, #tpu.dimension_semantics<parallel>], iteration_bounds = array<i64: 1, 2>, scalar_prefetch = 0 : i64, scratch_operands = 0 : i64, tpu.core_type = #tpu.core_type<tc>, window_params = [{transform_indices = @transform_0, window_bounds = array<i64: 8, 32>}, {pipeline_mode = #tpu.pipeline_mode<synchronous>, transform_indices = @transform_1, window_bounds = array<i64: 32, 128>}, {pipeline_mode = #tpu.pipeline_mode<synchronous>, transform_indices = @transform_2, window_bounds = array<i64: 1, 128>}, {pipeline_mode = #tpu.pipeline_mode<synchronous>, transform_indices = @transform_3, window_bounds = array<i64: 128, 128>}, {pipeline_mode = #tpu.pipeline_mode<synchronous>, transform_indices = @transform_4, window_bounds = array<i64: 1, 128>}, {transform_indices = @transform_5, window_bounds = array<i64: 8, 128>}]} {
    %c0 = arith.constant 0 : index
    %c0_0 = arith.constant 0 : index
    %0 = vector.load %arg2[%c0, %c0_0] : memref<8x32xf32, #tpu.memory_space<vmem>>, vector<8x32xf32>
    %c0_1 = arith.constant 0 : index
    %c0_2 = arith.constant 0 : index
    %1 = vector.load %arg3[%c0_1, %c0_2] : memref<32x128xf32, #tpu.memory_space<vmem>>, vector<32x128xf32>
    %cst = arith.constant dense<0.000000e+00> : vector<8x128xf32>
    %2 = tpu.matmul %0, %1, %cst {dimension_numbers = #tpu.dot_dimension_numbers<[1], [0], [0], [1], [0, 0, 1, 1], [], []>} : vector<8x32xf32>, vector<32x128xf32>, vector<8x128xf32> -> vector<8x128xf32>
    %c0_3 = arith.constant 0 : index
    %c0_4 = arith.constant 0 : index
    %3 = vector.load %arg4[%c0_3, %c0_4] : memref<1x128xf32, #tpu.memory_space<vmem>>, vector<1x128xf32>
    %4 = vector.broadcast %3 : vector<1x128xf32> to vector<8x128xf32>
    %5 = arith.addf %2, %4 : vector<8x128xf32>
    %cst_5 = arith.constant 0.000000e+00 : f32
    %6 = vector.broadcast %cst_5 : f32 to vector<8x128xf32>
    %7 = arith.maximumf %5, %6 : vector<8x128xf32>
    %c0_6 = arith.constant 0 : index
    %c0_7 = arith.constant 0 : index
    %8 = vector.load %arg5[%c0_6, %c0_7] : memref<128x128xf32, #tpu.memory_space<vmem>>, vector<128x128xf32>
    %cst_8 = arith.constant dense<0.000000e+00> : vector<8x128xf32>
    %9 = tpu.matmul %7, %8, %cst_8 {dimension_numbers = #tpu.dot_dimension_numbers<[1], [0], [0], [1], [0, 0, 1, 1], [], []>} : vector<8x128xf32>, vector<128x128xf32>, vector<8x128xf32> -> vector<8x128xf32>
    %c0_9 = arith.constant 0 : index
    %c0_10 = arith.constant 0 : index
    %10 = vector.load %arg6[%c0_9, %c0_10] : memref<1x128xf32, #tpu.memory_space<vmem>>, vector<1x128xf32>
    %11 = vector.broadcast %10 : vector<1x128xf32> to vector<8x128xf32>
    %12 = arith.addf %9, %11 : vector<8x128xf32>
    %c0_11 = arith.constant 0 : index
    %c0_12 = arith.constant 0 : index
    %13 = vector.load %arg7[%c0_11, %c0_12] : memref<8x128xf32, #tpu.memory_space<vmem>>, vector<8x128xf32>
    tpu.vector_store %arg7[%c0_11, %c0_12], %12 {strides = array<i32>} : memref<8x128xf32, #tpu.memory_space<vmem>>, vector<8x128xf32>,
    return
  }
  func.func @transform_0(%arg0: i32, %arg1: i32) -> (i32, i32) {
    %c0_i32 = arith.constant 0 : i32
    %c0_i32_0 = arith.constant 0 : i32
    return %arg1, %c0_i32 : i32, i32
  }
  func.func @transform_1(%arg0: i32, %arg1: i32) -> (i32, i32) {
    %c0_i32 = arith.constant 0 : i32
    %c0_i32_0 = arith.constant 0 : i32
    %c0_i32_1 = arith.constant 0 : i32
    return %c0_i32, %c0_i32_0 : i32, i32
  }
  func.func @transform_2(%arg0: i32, %arg1: i32) -> (i32, i32) {
    %c0_i32 = arith.constant 0 : i32
    %c0_i32_0 = arith.constant 0 : i32
    %c0_i32_1 = arith.constant 0 : i32
    return %c0_i32, %c0_i32_0 : i32, i32
  }
  func.func @transform_3(%arg0: i32, %arg1: i32) -> (i32, i32) {
    %c0_i32 = arith.constant 0 : i32
    %c0_i32_0 = arith.constant 0 : i32
    return %c0_i32, %arg0 : i32, i32
  }
  func.func @transform_4(%arg0: i32, %arg1: i32) -> (i32, i32) {
    %c0_i32 = arith.constant 0 : i32
    %c0_i32_0 = arith.constant 0 : i32
    return %c0_i32, %arg0 : i32, i32
  }
  func.func @transform_5(%arg0: i32, %arg1: i32) -> (i32, i32) {
    %c0_i32 = arith.constant 0 : i32
    return %arg1, %arg0 : i32, i32
  }
}

</mosaic_0001>

<bundles_post_ra>
// kernel: _forward_padded.1
= control target key start
LH: loop header
LB: loop body
LE: loop exit
PB: predicated region body
PF: predicated region fallthrough
CT: control target
= control target key end

     0   :  { %s1204_s0 = inlined_call_operand.hbm [shape: f32[16,32], index: 0, kind: input, shape index: {}]   ;;  %s1205_s1 = inlined_call_operand.hbm [shape: f32[32,128], index: 1, kind: input, shape index: {}]   ;;  %s1206_s2 = inlined_call_operand.vmem [shape: f32[1,128], index: 2, kind: input, shape index: {}]   ;;  %s1207_s3 = inlined_call_operand.hbm [shape: f32[128,128], index: 3, kind: input, shape index: {}]   ;;  %s1208_s4 = inlined_call_operand.vmem [shape: f32[1,128], index: 4, kind: input, shape index: {}]   ;;  %s1209_s5 = inlined_call_operand.hbm [shape: f32[16,128], index: 5, kind: output, shape index: {}]  }
   0x1   :  { %1213 = sst [smem:[#allocation12_spill]] %s1205_s1 }
   0x2   :  { %10 = vsyncpa [#allocation3], 0 }
   0x3   :  { %12 = vsyncpa [#allocation3 + $0x1], 0 }
   0x4   :  { %13 = vsyncpa [#allocation6], 0 }
   0x5   :  { %14 = vsyncpa [#allocation4], 0 }
   0x6   :  { %16 = vsyncpa [#allocation4 + $0x1], 0  ;;  %s992_s18 = smov 0   ;;  %s994_s19 = smov 0  }
   0x7   :  { %s996_s20 = smov 0   ;;  %s998_s21 = smov 0  }
   0x8   :  { %s1000_s22 = smov 0   ;;  %s1002_s23 = smov 0  }
   0x9 LB: > { %s612_s24 = sadd.s32 4294967295, %s952_s23   ;;  %s613_s25 = sadd.s32 4294967294, %s952_s23   ;;  %s952_s23 = sphi %s1002_s23, %s22_s23   ;;  %s948_s22 = sphi %s1000_s22, %s1231_s22   ;;  %s944_s21 = sphi %s998_s21, %s1230_s21   ;;  %s940_s20 = sphi %s996_s20, %s1229_s20   ;;  %s936_s19 = sphi %s994_s19, %s1228_s19   ;;  %s932_s18 = sphi %s992_s18, %s1227_s18  }
   0xa   : > { %p54_p0 = scmp.ne.s32.totalorder %s936_s19, %s932_s18  ;;  %p1026_p1 = scmp.eq.s32.totalorder %s612_s24, 0 }
   0xb   : > { %p1030_p2 = scmp.eq.s32.totalorder %s612_s24, 1  ;;  %p180_p3 = scmp.eq.s32.totalorder %s613_s25, 1 }
   0xc   : > { %s1214_s26 = scalar_select %p1026_p1, 1, 0 }
   0xd   : > { %p1036_p4 = por %p1026_p1, %p54_p0  ;;  %p614_p5 = scmp.ge.s32.totalorder %s952_s23, 1 }
   0xe   : > { %p1041_p6 = por %p180_p3, %p54_p0  ;;  %p187_p7 = scmp.lt.s32.totalorder %s952_s23, 3 }
   0xf   : > { %s1216_s28 = scalar_select %p1036_p4, 1, 0 }
  0x10   : > { %s1217_s29 = scalar_select %p1041_p6, 1, 0 }
  0x11   : > { %p1046_p8 = pnand %p614_p5, %p187_p7  ;;  %s954_s6 = smov [#allocation5]  }
  0x12   : > { %s199_s7 = sshll.u32 %s954_s6, 4  ;;  %s955_s9 = smov [#allocation7]   ;;  %s200_s7 = int_to_ptr.vmem [resolvable:$true] %s199_s7 }
  0x13   : > { %p713_p9 = pneg %p1046_p8  ;;  %s217_s10 = sshll.u32 %s955_s9, 4  ;;  %s218_s10 = int_to_ptr.vmem [resolvable:$true] %s217_s10 }
  0x14   : > { %s799_s11 = scalar_lea.vmem %s200_s7, 512  ;;  %p807_p5 = scmp.lt.s32.totalorder %s200_s7, %s200_s7 }
  0x15   : > { %p1055_p11 = pnand %p713_p9, %p1026_p1  ;;  %p800_p13 = scmp.ne.s32.totalorder %s200_s7, %s799_s11 }
  0x16   : > { %p808_p7 = scmp.lt.s32.totalorder %s799_s11, %s799_s11 }
  0x17   : > { %p790_p12 = pneg %p1055_p11 }
  0x18   : > { %p809_p10 = por %p808_p7, %p807_p5 }
  0x19   : > { %p802_p0 = pnand %p800_p13, %p790_p12 }
  0x1b   : > { %p803_p3 = pneg %p802_p0 }
  0x1d   : > { %p810_p9 = pnand %p809_p10, %p803_p3 }
  0x1f   : > { %813 = shalt.err (!%p810_p9)
}
  0x20   : > { %s956_s12 = smov 128   ;;  %s957_s13 = smov 8  }
  0x21   : > { %s1220_s1 = sld [smem:[#allocation12_spill]]  ;;  %s825_s16 = scalar_lea.vmem %s218_s10, 2048 }
  0x22   : > { %p826_p6 = scmp.ne.s32.totalorder %s218_s10, %s825_s16  ;;  %p833_p1 = scmp.lt.s32.totalorder %s218_s10, %s218_s10 }
  0x23   : > { %p834_p4 = scmp.lt.s32.totalorder %s825_s16, %s825_s16 }
  0x24   : > { %p828_p13 = pnand %p826_p6, %p790_p12 }
  0x25   : > { %p835_p5 = por %p834_p4, %p833_p1 }
  0x26   : > { %p829_p0 = pneg %p828_p13 }
  0x27   : > { %716 = dma.hbm_to_vmem [thread:$0]  (!%p1055_p11), %s1220_s1, 512, %s200_s7, [#allocation6], %s956_s12, %s956_s12, %s957_s13  }
  0x28   : > { %p836_p10 = pnand %p835_p5, %p829_p0 }
  0x2a   : > { %839 = shalt.err (!%p836_p10)
}
  0x2b   : > { %719 = dma.hbm_to_vmem [thread:$0]  (!%p1055_p11), %s1207_s3, 2048, %s218_s10, [#allocation6], %s956_s12, %s956_s12, %s957_s13  }
  0x2c   : > { %s31_s25 = sadd.s32 1, %s948_s22  ;;  %s41_s6 = sadd.s32 1, %s940_s20 }
  0x2d   : > { %p32_p1 = scmp.ge.s32.totalorder %s31_s25, 2  ;;  %p48_p4 = scmp.ne.s32.totalorder %s940_s20, %s936_s19 }
  0x2e   : > { %p49_p6 = scmp.eq.s32.totalorder %s952_s23, 0  ;;  %p730_p12 = scmp.lt.s32.totalorder %s952_s23, 2 }
  0x2f   : > { %s1233_s25 = smov (%p32_p1, %s31_s25), 0  ;;  %p1087_p7 = por %p1030_p2, %p48_p4 }
  0x30   : > { %p50_p3 = por %p49_p6, %p48_p4  ;;  %s38_s8 = ssub.s32 %s948_s22, %s1233_s25 }
  0x31   : > { %s237_s9 = sand.u32 1, %s940_s20   ;;  %p39_p9 = scmp.eq.s32.totalorder %s38_s8, 0 }
  0x32   : > { %s619_s10 = sshll.u32 %s237_s9, 3  ;;  %s620_s11 = sshll.u32 %s948_s22, 7 }
  0x33   : > { %s1096_s12 = scalar_select %p39_p9, %s940_s20, %s41_s6  }
  0x34   : > { %s246_s15 = scalar_lea.hbm %s1204_s0, %s620_s11  ;;  %s241_s16 = scalar_lea.vmem [#allocation2], %s619_s10 }
  0x35   : > { %s248_s17 = sshll.u32 %s241_s16, 4  ;;  %p1103_p11 = pnand %p730_p12, %p50_p3  ;;  %s249_s17 = int_to_ptr.vmem [resolvable:$true] %s248_s17 }
  0x36   : > { %s238_s24 = scalar_lea.sflag [#allocation3], %s237_s9  ;;  %s853_s8 = scalar_lea.vmem %s249_s17, 128 }
  0x37   : > { %p842_p2 = pneg %p1103_p11  ;;  %p854_p13 = scmp.ne.s32.totalorder %s249_s17, %s853_s8 }
  0x38   : > { %s958_s6 = smov [#allocation2]  }
  0x39   : > { %p856_p0 = pnand %p854_p13, %p842_p2  ;;  %s858_s1 = sshll.u32 %s958_s6, 4  ;;  %s859_s1 = int_to_ptr.vmem [resolvable:$false] %s858_s1 }
  0x3a   : > { %s860_s11 = scalar_lea.vmem %s859_s1, 256  ;;  %p861_p10 = scmp.lt.s32.totalorder %s249_s17, %s859_s1 }
  0x3b   : > { %p857_p5 = pneg %p856_p0  ;;  %p862_p1 = scmp.lt.s32.totalorder %s860_s11, %s853_s8 }
  0x3d   : > { %p863_p4 = por %p862_p1, %p861_p10 }
  0x3f   : > { %p864_p6 = pnand %p863_p4, %p857_p5 }
  0x41   : > { %867 = shalt.err (!%p864_p6)
}
  0x42   : > { %723 = dma.hbm_to_vmem [thread:$0]  (!%p1103_p11), %s246_s15, 128, %s249_s17, %s238_s24  }
  0x43   : > { %257 = sbr.rel (%p1046_p8) target bundleno = 491 (0x1eb), region = 40  ;;  %s1114_s9 = sand.u32 (!%p1046_p8), 1, %s936_s19  }
  0x44   : > { %s622_s10 = sshll.u32 (!%p1046_p8), %s1114_s9, 3  ;;  %s260_s13 = scalar_lea.sflag (!%p1046_p8), [#allocation3], %s1114_s9 }
  0x45   : > { %s263_s1 = scalar_lea.vmem (!%p1046_p8), [#allocation2], %s622_s10  ;;  %p1223_p12 = scmp.ne.s32.totalorder (!%p1046_p8), %s1216_s28, 0 }
  0x48   : > { %919 = dma.done.wait (%p1223_p12), %s260_s13, 128  }
  0x49   : > { %921 = vsyncadd (%p1223_p12), %s260_s13, 4294967168  ;;  %p1224_p3 = scmp.ne.s32.totalorder %s1214_s26, 0 }
  0x4b   : > { %923 = dma.done.wait (%p1224_p3), [#allocation6], 2560  }
  0x4c   : > { %925 = vsyncadd (%p1224_p3), [#allocation6], 4294964736  ;;  %v959_v0 = vmov 0.0   ;;  %vm960_vm0 = vmmov 0   ;;  %v308_v1 = vld [vmem:[#allocation5 + $0x18] sm:$0xff]  ;;  %v307_v2 = vld [vmem:[#allocation5 + $0x10] sm:$0xff] }
  0x4d   : > { %655 = vmatprep.subr.mxu0 %v959_v0  ;;  %663 = vmatprep.mubr.msk.f32.mxu0 %vm960_vm0, %v959_v0  ;;  %v406_v3 = vld [vmem:[#allocation7 + $0x78] sm:$0xff]  ;;  %v306_v4 = vld [vmem:[#allocation5 + $0x8] sm:$0xff]  ;;  %v405_v5 = vld [vmem:[#allocation7 + $0x70] sm:$0xff]  ;;  %vm316_vm1 = vcmask 261120   ;;  %s630_s15 = sshll.u32 %s944_s21, 7  ;;  %s300_s16 = scalar_lea.vmem [#allocation8], %s622_s10 }
  0x4e   : > { %666 = vmatprep.subr.mxu1 %v959_v0  ;;  %698 = vmatprep.mubr.msk.f32.mxu1 %vm960_vm0, %v959_v0  ;;  %v404_v6 = vld [vmem:[#allocation7 + $0x68] sm:$0xff]  ;;  %v305_v7 = vld [vmem:[#allocation5] sm:$0xff]  ;;  %v304_v8 = vld [vmem:[%s263_s1] sm:$0xff]  ;;  %s500_s17 = sshll.u32 %s300_s16, 4  ;;  %s1162_s8 = scalar_lea.hbm %s1209_s5, %s630_s15  ;;  %s501_s17 = int_to_ptr.vmem [resolvable:$true] %s500_s17 }
  0x4f   : > { %656 = vmatpush3.msra.mxu0 %v308_v1  ;;  %667 = vmatpush3.msra.mxu1 %v406_v3  ;;  %v403_v9 = vld [vmem:[#allocation7 + $0x60] sm:$0xff]  ;;  %v402_v10 = vld [vmem:[#allocation7 + $0x58] sm:$0xff]  ;;  %v401_v11 = vld [vmem:[#allocation7 + $0x50] sm:$0xff]  ;;  %s486_s6 = scalar_lea.sflag [#allocation4], %s1114_s9  ;;  %s868_s11 = scalar_lea.vmem %s501_s17, 128 }
  0x50   : > { %657 = vmatprep.subr.mxu0 %v959_v0  ;;  %668 = vmatprep.subr.mxu1 %v959_v0  ;;  %v400_v12 = vld [vmem:[#allocation7 + $0x48] sm:$0xff]  ;;  %v399_v13 = vld [vmem:[#allocation7 + $0x40] sm:$0xff]  ;;  %v398_v14 = vld [vmem:[#allocation7 + $0x38] sm:$0xff]  ;;  %p869_p8 = scmp.ne.s32.totalorder %s501_s17, %s868_s11  ;;  %s961_s21 = smov [#allocation8]  }
  0x51   : > { %658 = vmatpush3.msra.mxu0 %v307_v2  ;;  %669 = vmatpush3.msra.mxu1 %v405_v5  ;;  %v397_v15 = vld [vmem:[#allocation7 + $0x30] sm:$0xff]  ;;  %v396_v16 = vld [vmem:[#allocation7 + $0x28] sm:$0xff]  ;;  %v395_v17 = vld [vmem:[#allocation7 + $0x20] sm:$0xff]  ;;  %s872_s13 = sshll.u32 %s961_s21, 4  ;;  %s873_s13 = int_to_ptr.vmem [resolvable:$false] %s872_s13 }
  0x52   : > { %659 = vmatprep.subr.mxu0 %v959_v0  ;;  %670 = vmatprep.subr.mxu1 %v959_v0  ;;  %v394_v18 = vld [vmem:[#allocation7 + $0x18] sm:$0xff]  ;;  %v393_v19 = vld [vmem:[#allocation7 + $0x10] sm:$0xff]  ;;  %v392_v20 = vld [vmem:[#allocation7 + $0x8] sm:$0xff]  ;;  %p870_p9 = pnand %p869_p8, %p1087_p7  ;;  %s874_s10 = scalar_lea.vmem %s873_s13, 256 }
  0x53   : > { %660 = vmatpush3.msra.mxu0 %v306_v4  ;;  %671 = vmatpush3.msra.mxu1 %v404_v6  ;;  %v391_v21 = vld [vmem:[#allocation7] sm:$0xff]  ;;  %v626_v22 = vld [vmem:[%s1206_s2] ss:$0 sm:$0xff]  ;;  %p875_p2 = scmp.lt.s32.totalorder %s501_s17, %s873_s13  ;;  %p876_p13 = scmp.lt.s32.totalorder %s874_s10, %s868_s11 }
  0x54   : > { %661 = vmatprep.subr.mxu0 %v959_v0  ;;  %672 = vmatprep.subr.mxu1 %v959_v0  ;;  %v628_v27 = vld [vmem:[%s1208_s4] ss:$0 sm:$0xff]  ;;  %p871_p11 = pneg %p870_p9 }
  0x55   : > { %662 = vmatpush3.msra.mxu0 %v305_v7  ;;  %673 = vmatpush3.msra.mxu1 %v403_v9  ;;  %p877_p0 = por %p876_p13, %p875_p2 }
  0x56   : > { %664 = vmatmul.mubr.msk.f32.vlgmr.msra.gmra.mxu0 %vm316_vm1, %v304_v8  ;;  %674 = vmatprep.subr.mxu1 %v959_v0 }
  0x57   : > { %675 = vmatpush3.msra.mxu1 %v402_v10  ;;  %p878_p5 = pnand %p877_p0, %p871_p11 }
  0x58   : > { %676 = vmatprep.subr.mxu1 %v959_v0 }
  0x59   : > { %677 = vmatpush3.msra.mxu1 %v401_v11 }
  0x5a   : > { %678 = vmatprep.subr.mxu1 %v959_v0 }
  0x5b   : > { %679 = vmatpush3.msra.mxu1 %v400_v12 }
  0x5c   : > { %680 = vmatprep.subr.mxu1 %v959_v0 }
  0x5d   : > { %681 = vmatpush3.msra.mxu1 %v399_v13 }
  0x5e   : > { %682 = vmatprep.subr.mxu1 %v959_v0 }
  0x5f   : > { %683 = vmatpush3.msra.mxu1 %v398_v14 }
  0x60   : > { %684 = vmatprep.subr.mxu1 %v959_v0 }
  0x61   : > { %685 = vmatpush3.msra.mxu1 %v397_v15 }
  0x62   : > { %686 = vmatprep.subr.mxu1 %v959_v0 }
  0x63   : > { %687 = vmatpush3.msra.mxu1 %v396_v16 }
  0x64   : > { %688 = vmatprep.subr.mxu1 %v959_v0 }
  0x65   : > { %689 = vmatpush3.msra.mxu1 %v395_v17 }
  0x66   : > { %690 = vmatprep.subr.mxu1 %v959_v0 }
  0x67   : > { %691 = vmatpush3.msra.mxu1 %v394_v18 }
  0x68   : > { %692 = vmatprep.subr.mxu1 %v959_v0 }
  0x69   : > { %693 = vmatpush3.msra.mxu1 %v393_v19 }
  0x6a   : > { %694 = vmatprep.subr.mxu1 %v959_v0 }
  0x6b   : > { %695 = vmatpush3.msra.mxu1 %v392_v20 }
  0x6c   : > { %696 = vmatprep.subr.mxu1 %v959_v0 }
  0x6d   : > { %697 = vmatpush3.msra.mxu1 %v391_v21 }
 0x116   : > { %v386_v23 = vpop.f32.mrf.mxu0 }
 0x117   : > { %v387_v24 = vadd.f32 %v626_v22, %v386_v23 }
 0x118   : > { %v665_v25 = vpop.f32.mrf.mxu0 }
 0x119   : > { %v390_v26 = vmax.f32 %v387_v24, 0.0 }
 0x11b   : > { %699 = vmatmul.mubr.f32.vlgmr.msra.gmra.mxu1 %v390_v26 }
 0x1db   : > { %v480_v28 = vpop.f32.mrf.mxu1 }
 0x1dc   : > { %v481_v29 = vadd.f32 %v628_v27, %v480_v28 }
 0x1dd   : > { %v700_v30 = vpop.f32.mrf.mxu1 }
 0x1de   : > { %484 = vst [vmem:[%s300_s16] sm:$0xff] %v481_v29 }
 0x1df   : > { %881 = shalt.err (!%p878_p5)
}
 0x1e0   : > { %s882_s1 = scalar_lea.hbm %s1162_s8, 128  ;;  %s886_s28 = scalar_lea.hbm %s1209_s5, 256 }
 0x1e1   : > { %p883_p10 = scmp.ne.s32.totalorder %s1162_s8, %s882_s1  ;;  %p887_p6 = scmp.lt.s32.totalorder %s1162_s8, %s1209_s5 }
 0x1e2   : > { %p888_p12 = scmp.lt.s32.totalorder %s886_s28, %s882_s1 }
 0x1e3   : > { %p884_p1 = pnand %p883_p10, %p1087_p7 }
 0x1e4   : > { %p889_p3 = por %p888_p12, %p887_p6 }
 0x1e5   : > { %p885_p4 = pneg %p884_p1 }
 0x1e7   : > { %p890_p8 = pnand %p889_p3, %p885_p4 }
 0x1e9   : > { %893 = shalt.err (!%p890_p8)
}
 0x1ea   : > { %711 = dma.vmem_to_hbm [thread:$0]  (%p1087_p7), %s501_s17, 128, %s1162_s8, %s486_s6  }
 0x1eb PF: > { %s512_s15 = sand.u32 1, %s932_s18   ;;  %p1225_p9 = scmp.ne.s32.totalorder %s1217_s29, 0 }
 0x1ec   : > { %p1226_p11 = scmp.ge.s32.totalorder %s952_s23, 2  ;;  %s513_s16 = scalar_lea.sflag [#allocation4], %s512_s15 }
 0x1ee   : > { %p725_p2 = pnand %p1226_p11, %p1225_p9 }
 0x1f0   : > { %p726_p13 = pneg %p725_p2 }
 0x1f2   : > { %927 = dma.done.wait (%p726_p13), %s513_s16, 128  }
 0x1f3   : > { %929 = vsyncadd (%p726_p13), %s513_s16, 4294967168  ;;  %s22_s23 = sadd.s32 1, %s952_s23   ;;  %s1227_s18 = smov %s936_s19 }
 0x1f4   : > { %p19_p0 = scmp.ge.s32.totalorder %s22_s23, 4   ;;  %s1228_s19 = smov %s940_s20 }
 0x1f5   : > { %s1229_s20 = smov %s1096_s12  ;;  %s1230_s21 = smov %s948_s22 }
 0x1f6   : > { %s1231_s22 = smov %s1233_s25  ;;  %21 = sbr.rel (!%p19_p0) target bundleno = 9 (0x9), region = 97 }
 0x1fb   :  { %518 = vsyncpa [#allocation3], 1 }
 0x1fc   :  { %520 = vsyncpa [#allocation3 + $0x1], 1 }
 0x1fd   :  { %521 = vsyncpa [#allocation6], 1 }
 0x1fe   :  { %522 = vsyncpa [#allocation4], 1 }
 0x1ff   :  { %524 = vsyncpa [#allocation4 + $0x1], 1 }

</bundles_post_ra>
